<compile_context>
chip_gen: v6e
topology: v6e:2x2x1
jax: 0.10.0
libtpu: 0.0.40
codegen_flags: <defaults>
</compile_context>

<pallas_src>
import functools

import jax
import jax.numpy as jnp
from jax import lax
from jax.experimental import pallas as pl
from jax.experimental.pallas import tpu as pltpu

EPS = 1e-5                       # PyTorch default eps for BatchNorm1d / LayerNorm
EMB_DIM = 32
E_TOT = 4 * EMB_DIM              # 128: width of the concatenated embeddings
VOCAB_SIZES = (5, 30, 30, 150)   # Pos, Team, Opp, Pos_Opp
VOCAB_OFFSETS = (0, 5, 35, 65)   # row offsets of each table in the packed table
TOTAL_VOCAB = sum(VOCAB_SIZES)   # 215
VOCAB_PAD = 256                  # packed-table rows / one-hot width (lane multiple)

# ---- packed small-parameter slab layout (rows of a (24, 256) f32 array) ----
R_IN_G, R_IN_B = 0, 1            # input LN gamma/beta: cols [0:d_in]=x part, [128:256]=emb part
R_B1, R_BN1G, R_BN1B, R_LN1G, R_LN1B = 2, 3, 4, 5, 6       # 256-wide
R_B2, R_BN2G, R_BN2B, R_LN2G, R_LN2B = 7, 8, 9, 10, 11     # 128-wide
R_B3, R_BN3G, R_BN3B, R_LN3G, R_LN3B = 12, 13, 14, 15, 16  # 64-wide
R_WO, R_BO = 17, 18              # output-head weight row [:64], bias at [0:1]
PSLAB_ROWS, PSLAB_COLS = 24, 256


def _mlp_kernel(d_in,
                x_ref, idx_ref, etbl_ref, ps_ref,
                w1x_ref, w1e_ref, w2_ref, w3_ref,
                out_ref):
    B = x_ref.shape[0]
    d_tot = float(d_in + E_TOT)  # LayerNorm width of the virtual concat (160)

    def layernorm(h, g, b):
        mu = jnp.mean(h, axis=-1, keepdims=True)
        var = jnp.mean(jnp.square(h - mu), axis=-1, keepdims=True)
        return (h - mu) * lax.rsqrt(var + EPS) * g + b

    def batchnorm(h, g, b):
        # training-mode BatchNorm1d: per-feature batch stats, biased variance
        mu = jnp.mean(h, axis=0, keepdims=True)
        var = jnp.mean(jnp.square(h - mu), axis=0, keepdims=True)
        return (h - mu) * lax.rsqrt(var + EPS) * g + b

    def bn_ln_relu(z, rbg, rbb, rlg, rlb, dout):
        z = batchnorm(z, ps_ref[rbg:rbg + 1, :dout], ps_ref[rbb:rbb + 1, :dout])
        z = layernorm(z, ps_ref[rlg:rlg + 1, :dout], ps_ref[rlb:rlb + 1, :dout])
        return jnp.maximum(z, 0.0)

    # ---- embedding gather: exact one-hot matmul over the packed block-diagonal table ----
    # Offsets are Python int scalars (no captured constant arrays).
    vi = lax.broadcasted_iota(jnp.int32, (B, VOCAB_PAD), 1)             # (B, 256)
    onehot = ((vi == idx_ref[:, 0:1] + VOCAB_OFFSETS[0]) |
              (vi == idx_ref[:, 1:2] + VOCAB_OFFSETS[1]) |
              (vi == idx_ref[:, 2:3] + VOCAB_OFFSETS[2]) |
              (vi == idx_ref[:, 3:4] + VOCAB_OFFSETS[3])).astype(jnp.float32)
    emb = jnp.dot(onehot, etbl_ref[...],
                  preferred_element_type=jnp.float32)                   # (B, 128)

    # ---- input LayerNorm with joint stats over the virtual concat [x | emb] ----
    x = x_ref[...]                                                      # (B, d_in)
    mu = (jnp.sum(x, axis=-1, keepdims=True) +
          jnp.sum(emb, axis=-1, keepdims=True)) / d_tot
    dx = x - mu
    de = emb - mu
    var = (jnp.sum(dx * dx, axis=-1, keepdims=True) +
           jnp.sum(de * de, axis=-1, keepdims=True)) / d_tot
    inv = lax.rsqrt(var + EPS)
    xn = dx * inv * ps_ref[R_IN_G:R_IN_G + 1, :d_in] + ps_ref[R_IN_B:R_IN_B + 1, :d_in]
    en = (de * inv * ps_ref[R_IN_G:R_IN_G + 1, 128:128 + E_TOT]
          + ps_ref[R_IN_B:R_IN_B + 1, 128:128 + E_TOT])

    # ---- fc1 as a split matmul over the two halves of the concat (bf16 on MXU) ----
    z1 = (jnp.dot(xn.astype(jnp.bfloat16), w1x_ref[...],
                  preferred_element_type=jnp.float32)
          + jnp.dot(en.astype(jnp.bfloat16), w1e_ref[...],
                    preferred_element_type=jnp.float32)
          + ps_ref[R_B1:R_B1 + 1, :256])
    h1 = bn_ln_relu(z1, R_BN1G, R_BN1B, R_LN1G, R_LN1B, 256)

    z2 = (jnp.dot(h1.astype(jnp.bfloat16), w2_ref[...],
                  preferred_element_type=jnp.float32)
          + ps_ref[R_B2:R_B2 + 1, :128])
    h2 = bn_ln_relu(z2, R_BN2G, R_BN2B, R_LN2G, R_LN2B, 128)

    z3 = (jnp.dot(h2.astype(jnp.bfloat16), w3_ref[...],
                  preferred_element_type=jnp.float32)
          + ps_ref[R_B3:R_B3 + 1, :64])
    h3 = bn_ln_relu(z3, R_BN3G, R_BN3B, R_LN3G, R_LN3B, 64)

    # ---- output head: VPU multiply + lane reduce (no N=1 MXU matmul) ----
    wo = ps_ref[R_WO:R_WO + 1, :64]
    bo = ps_ref[R_BO:R_BO + 1, 0:1]
    y = jnp.sum(h3 * wo, axis=-1, keepdims=True) + bo                   # (B, 1)
    # lane-dense store; wrapper slices column 0
    out_ref[...] = jnp.broadcast_to(y, (B, 128))


def init_params(key, input_size, embedding_dim=EMB_DIM):
    assert embedding_dim == EMB_DIM and input_size <= 128
    total_in = input_size + 4 * embedding_dim
    keys = jax.random.split(key, 8)

    def emb_tbl(k, n):
        # nn.init.normal_(weight, mean=0.0, std=0.01)
        return 0.01 * jax.random.normal(k, (n, embedding_dim), jnp.float32)

    def kaiming(k, fan_in, shape):
        # kaiming_normal_(mode='fan_in', nonlinearity='relu') -> std = sqrt(2/fan_in)
        return jnp.sqrt(2.0 / fan_in) * jax.random.normal(k, shape, jnp.float32)

    # Block-diagonal packed embedding table: table t occupies rows
    # [off_t, off_t + vocab_t) and columns [t*emb_dim, (t+1)*emb_dim).
    etbl = jnp.zeros((VOCAB_PAD, E_TOT), jnp.float32)
    for t, (kk, n, off) in enumerate(zip(keys[:4], VOCAB_SIZES, VOCAB_OFFSETS)):
        etbl = etbl.at[off:off + n,
                       t * embedding_dim:(t + 1) * embedding_dim].set(emb_tbl(kk, n))

    # Linear weights stored (in_features, out_features); bf16 for native MXU feed.
    w1 = kaiming(keys[4], total_in, (total_in, 256))
    w1x = w1[:input_size].astype(jnp.bfloat16)       # rows hitting the x half
    w1e = w1[input_size:].astype(jnp.bfloat16)       # rows hitting the embedding half
    w2 = kaiming(keys[5], 256, (256, 128)).astype(jnp.bfloat16)
    w3 = kaiming(keys[6], 128, (128, 64)).astype(jnp.bfloat16)
    wo = kaiming(keys[7], 64, (64,))                 # output head kept f32 (VPU path)

    # One packed slab for every small per-feature vector (linear biases = 0,
    # BN/LN gammas = 1, betas = 0, output weight/bias).
    ps = jnp.zeros((PSLAB_ROWS, PSLAB_COLS), jnp.float32)
    ps = ps.at[R_IN_G, :input_size].set(1.0)                 # input LN gamma (x part)
    ps = ps.at[R_IN_G, 128:128 + E_TOT].set(1.0)             # input LN gamma (emb part)
    for rg, d in ((R_BN1G, 256), (R_LN1G, 256),
                  (R_BN2G, 128), (R_LN2G, 128),
                  (R_BN3G, 64), (R_LN3G, 64)):
        ps = ps.at[rg, :d].set(1.0)                          # gammas = 1 (betas stay 0)
    ps = ps.at[R_WO, :64].set(wo)                            # output weight row
    # R_BO stays 0.0 (output bias init = 0)

    return {'etbl': etbl, 'pslab': ps, 'w1x': w1x, 'w1e': w1e, 'w2': w2, 'w3': w3}


def mlp_forward(x, categorical_indices, params):
    B, d_in = x.shape
    kernel = functools.partial(_mlp_kernel, d_in)
    vmem = pl.BlockSpec(memory_space=pltpu.MemorySpace.VMEM)
    inputs = (x.astype(jnp.float32),
              categorical_indices.astype(jnp.int32),
              params['etbl'], params['pslab'],
              params['w1x'], params['w1e'], params['w2'], params['w3'])
    out = pl.pallas_call(
        kernel,
        out_shape=jax.ShapeDtypeStruct((B, 128), jnp.float32),
        in_specs=[vmem] * len(inputs),
        out_specs=vmem,
    )(*inputs)
    return out[:, :1]


if __name__ == "__main__":
    B = 8
    INPUT_SIZE = 32

    key = jax.random.PRNGKey(0)
    k_param, k_x, k_cat = jax.random.split(key, 3)

    params = init_params(k_param, INPUT_SIZE, EMB_DIM)

    x = jax.random.normal(k_x, (B, INPUT_SIZE), jnp.float32)
    vocab_caps = jnp.array(VOCAB_SIZES, jnp.int32)
    categorical_indices = (
        jax.random.randint(k_cat, (B, 4), 0, 1_000_000, jnp.int32) % vocab_caps
    ).astype(jnp.int32)

    out = jax.jit(mlp_forward)(x, categorical_indices, params)
    out = jax.block_until_ready(out)
    assert out.shape == (B, 1) and out.dtype == jnp.float32
    assert bool(jnp.all(jnp.isfinite(out)))
    print("KERNEL_OK")
</pallas_src>

<mosaic_0001>
module attributes {stable_mosaic.version = 11 : i64} {
  func.func @_mlp_kernel(%arg0: memref<8x32xf32, #tpu.memory_space<vmem>>, %arg1: memref<8x4xi32, #tpu.memory_space<vmem>>, %arg2: memref<256x128xf32, #tpu.memory_space<vmem>>, %arg3: memref<24x256xf32, #tpu.memory_space<vmem>>, %arg4: memref<32x256xbf16, #tpu.memory_space<vmem>>, %arg5: memref<128x256xbf16, #tpu.memory_space<vmem>>, %arg6: memref<256x128xbf16, #tpu.memory_space<vmem>>, %arg7: memref<128x64xbf16, #tpu.memory_space<vmem>>, %arg8: memref<8x128xf32, #tpu.memory_space<vmem>>) attributes {dimension_semantics = [], scalar_prefetch = 0 : i64, scratch_operands = 0 : i64, tpu.core_type = #tpu.core_type<tc>} {
    %0 = tpu.iota {dimensions = array<i32: 1>} : vector<8x256xi32>
    %c0 = arith.constant 0 : index
    %c0_0 = arith.constant 0 : index
    %1 = vector.load %arg1[%c0, %c0_0] : memref<8x4xi32, #tpu.memory_space<vmem>>, vector<8x1xi32>
    %c0_i32 = arith.constant 0 : i32
    %2 = vector.broadcast %c0_i32 : i32 to vector<8x1xi32>
    %3 = arith.addi %1, %2 : vector<8x1xi32>
    %4 = vector.broadcast %3 : vector<8x1xi32> to vector<8x256xi32>
    %5 = arith.cmpi eq, %0, %4 : vector<8x256xi32>
    %c0_1 = arith.constant 0 : index
    %c1 = arith.constant 1 : index
    %6 = vector.load %arg1[%c0_1, %c1] : memref<8x4xi32, #tpu.memory_space<vmem>>, vector<8x1xi32>
    %c5_i32 = arith.constant 5 : i32
    %7 = vector.broadcast %c5_i32 : i32 to vector<8x1xi32>
    %8 = arith.addi %6, %7 : vector<8x1xi32>
    %9 = vector.broadcast %8 : vector<8x1xi32> to vector<8x256xi32>
    %10 = arith.cmpi eq, %0, %9 : vector<8x256xi32>
    %11 = arith.ori %5, %10 : vector<8x256xi1>
    %c0_2 = arith.constant 0 : index
    %c2 = arith.constant 2 : index
    %12 = vector.load %arg1[%c0_2, %c2] : memref<8x4xi32, #tpu.memory_space<vmem>>, vector<8x1xi32>
    %c35_i32 = arith.constant 35 : i32
    %13 = vector.broadcast %c35_i32 : i32 to vector<8x1xi32>
    %14 = arith.addi %12, %13 : vector<8x1xi32>
    %15 = vector.broadcast %14 : vector<8x1xi32> to vector<8x256xi32>
    %16 = arith.cmpi eq, %0, %15 : vector<8x256xi32>
    %17 = arith.ori %11, %16 : vector<8x256xi1>
    %c0_3 = arith.constant 0 : index
    %c3 = arith.constant 3 : index
    %18 = vector.load %arg1[%c0_3, %c3] : memref<8x4xi32, #tpu.memory_space<vmem>>, vector<8x1xi32>
    %c65_i32 = arith.constant 65 : i32
    %19 = vector.broadcast %c65_i32 : i32 to vector<8x1xi32>
    %20 = arith.addi %18, %19 : vector<8x1xi32>
    %21 = vector.broadcast %20 : vector<8x1xi32> to vector<8x256xi32>
    %22 = arith.cmpi eq, %0, %21 : vector<8x256xi32>
    %23 = arith.ori %17, %22 : vector<8x256xi1>
    %24 = arith.extui %23 : vector<8x256xi1> to vector<8x256xi32>
    %25 = arith.sitofp %24 : vector<8x256xi32> to vector<8x256xf32>
    %c0_4 = arith.constant 0 : index
    %c0_5 = arith.constant 0 : index
    %26 = vector.load %arg2[%c0_4, %c0_5] : memref<256x128xf32, #tpu.memory_space<vmem>>, vector<256x128xf32>
    %cst = arith.constant dense<0.000000e+00> : vector<8x128xf32>
    %27 = tpu.matmul %25, %26, %cst {dimension_numbers = #tpu.dot_dimension_numbers<[1], [0], [0], [1], [0, 0, 1, 1], [], []>} : vector<8x256xf32>, vector<256x128xf32>, vector<8x128xf32> -> vector<8x128xf32>
    %c0_6 = arith.constant 0 : index
    %c0_7 = arith.constant 0 : index
    %28 = vector.load %arg0[%c0_6, %c0_7] : memref<8x32xf32, #tpu.memory_space<vmem>>, vector<8x32xf32>
    %cst_8 = arith.constant dense<0.000000e+00> : vector<8xf32>
    %29 = vector.multi_reduction <add>, %28, %cst_8 [1] : vector<8x32xf32> to vector<8xf32>
    %30 = vector.shape_cast %29 : vector<8xf32> to vector<8x1xf32>
    %cst_9 = arith.constant dense<0.000000e+00> : vector<8xf32>
    %31 = vector.multi_reduction <add>, %27, %cst_9 [1] : vector<8x128xf32> to vector<8xf32>
    %32 = vector.shape_cast %31 : vector<8xf32> to vector<8x1xf32>
    %33 = arith.addf %30, %32 : vector<8x1xf32>
    %cst_10 = arith.constant 1.600000e+02 : f32
    %34 = vector.broadcast %cst_10 : f32 to vector<8x1xf32>
    %35 = arith.divf %33, %34 : vector<8x1xf32>
    %36 = vector.broadcast %35 : vector<8x1xf32> to vector<8x32xf32>
    %37 = arith.subf %28, %36 : vector<8x32xf32>
    %38 = vector.broadcast %35 : vector<8x1xf32> to vector<8x128xf32>
    %39 = arith.subf %27, %38 : vector<8x128xf32>
    %40 = arith.mulf %37, %37 : vector<8x32xf32>
    %cst_11 = arith.constant dense<0.000000e+00> : vector<8xf32>
    %41 = vector.multi_reduction <add>, %40, %cst_11 [1] : vector<8x32xf32> to vector<8xf32>
    %42 = vector.shape_cast %41 : vector<8xf32> to vector<8x1xf32>
    %43 = arith.mulf %39, %39 : vector<8x128xf32>
    %cst_12 = arith.constant dense<0.000000e+00> : vector<8xf32>
    %44 = vector.multi_reduction <add>, %43, %cst_12 [1] : vector<8x128xf32> to vector<8xf32>
    %45 = vector.shape_cast %44 : vector<8xf32> to vector<8x1xf32>
    %46 = arith.addf %42, %45 : vector<8x1xf32>
    %cst_13 = arith.constant 1.600000e+02 : f32
    %47 = vector.broadcast %cst_13 : f32 to vector<8x1xf32>
    %48 = arith.divf %46, %47 : vector<8x1xf32>
    %cst_14 = arith.constant 9.99999974E-6 : f32
    %49 = vector.broadcast %cst_14 : f32 to vector<8x1xf32>
    %50 = arith.addf %48, %49 : vector<8x1xf32>
    %51 = math.rsqrt %50 : vector<8x1xf32>
    %52 = vector.broadcast %51 : vector<8x1xf32> to vector<8x32xf32>
    %53 = arith.mulf %37, %52 : vector<8x32xf32>
    %c0_15 = arith.constant 0 : index
    %c0_16 = arith.constant 0 : index
    %54 = vector.load %arg3[%c0_15, %c0_16] : memref<24x256xf32, #tpu.memory_space<vmem>>, vector<1x32xf32>
    %55 = vector.broadcast %54 : vector<1x32xf32> to vector<8x32xf32>
    %56 = arith.mulf %53, %55 : vector<8x32xf32>
    %c1_17 = arith.constant 1 : index
    %c0_18 = arith.constant 0 : index
    %57 = vector.load %arg3[%c1_17, %c0_18] : memref<24x256xf32, #tpu.memory_space<vmem>>, vector<1x32xf32>
    %58 = vector.broadcast %57 : vector<1x32xf32> to vector<8x32xf32>
    %59 = arith.addf %56, %58 : vector<8x32xf32>
    %60 = vector.broadcast %51 : vector<8x1xf32> to vector<8x128xf32>
    %61 = arith.mulf %39, %60 : vector<8x128xf32>
    %c0_19 = arith.constant 0 : index
    %c128 = arith.constant 128 : index
    %62 = vector.load %arg3[%c0_19, %c128] : memref<24x256xf32, #tpu.memory_space<vmem>>, vector<1x128xf32>
    %63 = vector.broadcast %62 : vector<1x128xf32> to vector<8x128xf32>
    %64 = arith.mulf %61, %63 : vector<8x128xf32>
    %c1_20 = arith.constant 1 : index
    %c128_21 = arith.constant 128 : index
    %65 = vector.load %arg3[%c1_20, %c128_21] : memref<24x256xf32, #tpu.memory_space<vmem>>, vector<1x128xf32>
    %66 = vector.broadcast %65 : vector<1x128xf32> to vector<8x128xf32>
    %67 = arith.addf %64, %66 : vector<8x128xf32>
    %68 = arith.truncf %59 : vector<8x32xf32> to vector<8x32xbf16>
    %c0_22 = arith.constant 0 : index
    %c0_23 = arith.constant 0 : index
    %69 = vector.load %arg4[%c0_22, %c0_23] : memref<32x256xbf16, #tpu.memory_space<vmem>>, vector<32x256xbf16>
    %cst_24 = arith.constant dense<0.000000e+00> : vector<8x256xf32>
    %70 = tpu.matmul %68, %69, %cst_24 {dimension_numbers = #tpu.dot_dimension_numbers<[1], [0], [0], [1], [0, 0, 1, 1], [], []>} : vector<8x32xbf16>, vector<32x256xbf16>, vector<8x256xf32> -> vector<8x256xf32>
    %71 = arith.truncf %67 : vector<8x128xf32> to vector<8x128xbf16>
    %c0_25 = arith.constant 0 : index
    %c0_26 = arith.constant 0 : index
    %72 = vector.load %arg5[%c0_25, %c0_26] : memref<128x256xbf16, #tpu.memory_space<vmem>>, vector<128x256xbf16>
    %cst_27 = arith.constant dense<0.000000e+00> : vector<8x256xf32>
    %73 = tpu.matmul %71, %72, %cst_27 {dimension_numbers = #tpu.dot_dimension_numbers<[1], [0], [0], [1], [0, 0, 1, 1], [], []>} : vector<8x128xbf16>, vector<128x256xbf16>, vector<8x256xf32> -> vector<8x256xf32>
    %74 = arith.addf %70, %73 : vector<8x256xf32>
    %c2_28 = arith.constant 2 : index
    %c0_29 = arith.constant 0 : index
    %75 = vector.load %arg3[%c2_28, %c0_29] : memref<24x256xf32, #tpu.memory_space<vmem>>, vector<1x256xf32>
    %76 = vector.broadcast %75 : vector<1x256xf32> to vector<8x256xf32>
    %77 = arith.addf %74, %76 : vector<8x256xf32>
    %c3_30 = arith.constant 3 : index
    %c0_31 = arith.constant 0 : index
    %78 = vector.load %arg3[%c3_30, %c0_31] : memref<24x256xf32, #tpu.memory_space<vmem>>, vector<1x256xf32>
    %c4 = arith.constant 4 : index
    %c0_32 = arith.constant 0 : index
    %79 = vector.load %arg3[%c4, %c0_32] : memref<24x256xf32, #tpu.memory_space<vmem>>, vector<1x256xf32>
    %cst_33 = arith.constant dense<0.000000e+00> : vector<256xf32>
    %80 = vector.multi_reduction <add>, %77, %cst_33 [0] : vector<8x256xf32> to vector<256xf32>
    %81 = vector.shape_cast %80 : vector<256xf32> to vector<1x256xf32>
    %cst_34 = arith.constant 8.000000e+00 : f32
    %82 = vector.broadcast %cst_34 : f32 to vector<1x256xf32>
    %83 = arith.divf %81, %82 : vector<1x256xf32>
    %84 = vector.broadcast %83 : vector<1x256xf32> to vector<8x256xf32>
    %85 = arith.subf %77, %84 : vector<8x256xf32>
    %86 = arith.mulf %85, %85 : vector<8x256xf32>
    %cst_35 = arith.constant dense<0.000000e+00> : vector<256xf32>
    %87 = vector.multi_reduction <add>, %86, %cst_35 [0] : vector<8x256xf32> to vector<256xf32>
    %88 = vector.shape_cast %87 : vector<256xf32> to vector<1x256xf32>
    %cst_36 = arith.constant 8.000000e+00 : f32
    %89 = vector.broadcast %cst_36 : f32 to vector<1x256xf32>
    %90 = arith.divf %88, %89 : vector<1x256xf32>
    %91 = vector.broadcast %83 : vector<1x256xf32> to vector<8x256xf32>
    %92 = arith.subf %77, %91 : vector<8x256xf32>
    %cst_37 = arith.constant 9.99999974E-6 : f32
    %93 = vector.broadcast %cst_37 : f32 to vector<1x256xf32>
    %94 = arith.addf %90, %93 : vector<1x256xf32>
    %95 = math.rsqrt %94 : vector<1x256xf32>
    %96 = vector.broadcast %95 : vector<1x256xf32> to vector<8x256xf32>
    %97 = arith.mulf %92, %96 : vector<8x256xf32>
    %98 = vector.broadcast %78 : vector<1x256xf32> to vector<8x256xf32>
    %99 = arith.mulf %97, %98 : vector<8x256xf32>
    %100 = vector.broadcast %79 : vector<1x256xf32> to vector<8x256xf32>
    %101 = arith.addf %99, %100 : vector<8x256xf32>
    %c5 = arith.constant 5 : index
    %c0_38 = arith.constant 0 : index
    %102 = vector.load %arg3[%c5, %c0_38] : memref<24x256xf32, #tpu.memory_space<vmem>>, vector<1x256xf32>
    %c6 = arith.constant 6 : index
    %c0_39 = arith.constant 0 : index
    %103 = vector.load %arg3[%c6, %c0_39] : memref<24x256xf32, #tpu.memory_space<vmem>>, vector<1x256xf32>
    %cst_40 = arith.constant dense<0.000000e+00> : vector<8xf32>
    %104 = vector.multi_reduction <add>, %101, %cst_40 [1] : vector<8x256xf32> to vector<8xf32>
    %105 = vector.shape_cast %104 : vector<8xf32> to vector<8x1xf32>
    %cst_41 = arith.constant 2.560000e+02 : f32
    %106 = vector.broadcast %cst_41 : f32 to vector<8x1xf32>
    %107 = arith.divf %105, %106 : vector<8x1xf32>
    %108 = vector.broadcast %107 : vector<8x1xf32> to vector<8x256xf32>
    %109 = arith.subf %101, %108 : vector<8x256xf32>
    %110 = arith.mulf %109, %109 : vector<8x256xf32>
    %cst_42 = arith.constant dense<0.000000e+00> : vector<8xf32>
    %111 = vector.multi_reduction <add>, %110, %cst_42 [1] : vector<8x256xf32> to vector<8xf32>
    %112 = vector.shape_cast %111 : vector<8xf32> to vector<8x1xf32>
    %cst_43 = arith.constant 2.560000e+02 : f32
    %113 = vector.broadcast %cst_43 : f32 to vector<8x1xf32>
    %114 = arith.divf %112, %113 : vector<8x1xf32>
    %115 = vector.broadcast %107 : vector<8x1xf32> to vector<8x256xf32>
    %116 = arith.subf %101, %115 : vector<8x256xf32>
    %cst_44 = arith.constant 9.99999974E-6 : f32
    %117 = vector.broadcast %cst_44 : f32 to vector<8x1xf32>
    %118 = arith.addf %114, %117 : vector<8x1xf32>
    %119 = math.rsqrt %118 : vector<8x1xf32>
    %120 = vector.broadcast %119 : vector<8x1xf32> to vector<8x256xf32>
    %121 = arith.mulf %116, %120 : vector<8x256xf32>
    %122 = vector.broadcast %102 : vector<1x256xf32> to vector<8x256xf32>
    %123 = arith.mulf %121, %122 : vector<8x256xf32>
    %124 = vector.broadcast %103 : vector<1x256xf32> to vector<8x256xf32>
    %125 = arith.addf %123, %124 : vector<8x256xf32>
    %cst_45 = arith.constant 0.000000e+00 : f32
    %126 = vector.broadcast %cst_45 : f32 to vector<8x256xf32>
    %127 = arith.maximumf %125, %126 : vector<8x256xf32>
    %128 = arith.truncf %127 : vector<8x256xf32> to vector<8x256xbf16>
    %c0_46 = arith.constant 0 : index
    %c0_47 = arith.constant 0 : index
    %129 = vector.load %arg6[%c0_46, %c0_47] : memref<256x128xbf16, #tpu.memory_space<vmem>>, vector<256x128xbf16>
    %cst_48 = arith.constant dense<0.000000e+00> : vector<8x128xf32>
    %130 = tpu.matmul %128, %129, %cst_48 {dimension_numbers = #tpu.dot_dimension_numbers<[1], [0], [0], [1], [0, 0, 1, 1], [], []>} : vector<8x256xbf16>, vector<256x128xbf16>, vector<8x128xf32> -> vector<8x128xf32>
    %c7 = arith.constant 7 : index
    %c0_49 = arith.constant 0 : index
    %131 = vector.load %arg3[%c7, %c0_49] : memref<24x256xf32, #tpu.memory_space<vmem>>, vector<1x128xf32>
    %132 = vector.broadcast %131 : vector<1x128xf32> to vector<8x128xf32>
    %133 = arith.addf %130, %132 : vector<8x128xf32>
    %c8 = arith.constant 8 : index
    %c0_50 = arith.constant 0 : index
    %134 = vector.load %arg3[%c8, %c0_50] : memref<24x256xf32, #tpu.memory_space<vmem>>, vector<1x128xf32>
    %c9 = arith.constant 9 : index
    %c0_51 = arith.constant 0 : index
    %135 = vector.load %arg3[%c9, %c0_51] : memref<24x256xf32, #tpu.memory_space<vmem>>, vector<1x128xf32>
    %cst_52 = arith.constant dense<0.000000e+00> : vector<128xf32>
    %136 = vector.multi_reduction <add>, %133, %cst_52 [0] : vector<8x128xf32> to vector<128xf32>
    %137 = vector.shape_cast %136 : vector<128xf32> to vector<1x128xf32>
    %cst_53 = arith.constant 8.000000e+00 : f32
    %138 = vector.broadcast %cst_53 : f32 to vector<1x128xf32>
    %139 = arith.divf %137, %138 : vector<1x128xf32>
    %140 = vector.broadcast %139 : vector<1x128xf32> to vector<8x128xf32>
    %141 = arith.subf %133, %140 : vector<8x128xf32>
    %142 = arith.mulf %141, %141 : vector<8x128xf32>
    %cst_54 = arith.constant dense<0.000000e+00> : vector<128xf32>
    %143 = vector.multi_reduction <add>, %142, %cst_54 [0] : vector<8x128xf32> to vector<128xf32>
    %144 = vector.shape_cast %143 : vector<128xf32> to vector<1x128xf32>
    %cst_55 = arith.constant 8.000000e+00 : f32
    %145 = vector.broadcast %cst_55 : f32 to vector<1x128xf32>
    %146 = arith.divf %144, %145 : vector<1x128xf32>
    %147 = vector.broadcast %139 : vector<1x128xf32> to vector<8x128xf32>
    %148 = arith.subf %133, %147 : vector<8x128xf32>
    %cst_56 = arith.constant 9.99999974E-6 : f32
    %149 = vector.broadcast %cst_56 : f32 to vector<1x128xf32>
    %150 = arith.addf %146, %149 : vector<1x128xf32>
    %151 = math.rsqrt %150 : vector<1x128xf32>
    %152 = vector.broadcast %151 : vector<1x128xf32> to vector<8x128xf32>
    %153 = arith.mulf %148, %152 : vector<8x128xf32>
    %154 = vector.broadcast %134 : vector<1x128xf32> to vector<8x128xf32>
    %155 = arith.mulf %153, %154 : vector<8x128xf32>
    %156 = vector.broadcast %135 : vector<1x128xf32> to vector<8x128xf32>
    %157 = arith.addf %155, %156 : vector<8x128xf32>
    %c10 = arith.constant 10 : index
    %c0_57 = arith.constant 0 : index
    %158 = vector.load %arg3[%c10, %c0_57] : memref<24x256xf32, #tpu.memory_space<vmem>>, vector<1x128xf32>
    %c11 = arith.constant 11 : index
    %c0_58 = arith.constant 0 : index
    %159 = vector.load %arg3[%c11, %c0_58] : memref<24x256xf32, #tpu.memory_space<vmem>>, vector<1x128xf32>
    %cst_59 = arith.constant dense<0.000000e+00> : vector<8xf32>
    %160 = vector.multi_reduction <add>, %157, %cst_59 [1] : vector<8x128xf32> to vector<8xf32>
    %161 = vector.shape_cast %160 : vector<8xf32> to vector<8x1xf32>
    %cst_60 = arith.constant 1.280000e+02 : f32
    %162 = vector.broadcast %cst_60 : f32 to vector<8x1xf32>
    %163 = arith.divf %161, %162 : vector<8x1xf32>
    %164 = vector.broadcast %163 : vector<8x1xf32> to vector<8x128xf32>
    %165 = arith.subf %157, %164 : vector<8x128xf32>
    %166 = arith.mulf %165, %165 : vector<8x128xf32>
    %cst_61 = arith.constant dense<0.000000e+00> : vector<8xf32>
    %167 = vector.multi_reduction <add>, %166, %cst_61 [1] : vector<8x128xf32> to vector<8xf32>
    %168 = vector.shape_cast %167 : vector<8xf32> to vector<8x1xf32>
    %cst_62 = arith.constant 1.280000e+02 : f32
    %169 = vector.broadcast %cst_62 : f32 to vector<8x1xf32>
    %170 = arith.divf %168, %169 : vector<8x1xf32>
    %171 = vector.broadcast %163 : vector<8x1xf32> to vector<8x128xf32>
    %172 = arith.subf %157, %171 : vector<8x128xf32>
    %cst_63 = arith.constant 9.99999974E-6 : f32
    %173 = vector.broadcast %cst_63 : f32 to vector<8x1xf32>
    %174 = arith.addf %170, %173 : vector<8x1xf32>
    %175 = math.rsqrt %174 : vector<8x1xf32>
    %176 = vector.broadcast %175 : vector<8x1xf32> to vector<8x128xf32>
    %177 = arith.mulf %172, %176 : vector<8x128xf32>
    %178 = vector.broadcast %158 : vector<1x128xf32> to vector<8x128xf32>
    %179 = arith.mulf %177, %178 : vector<8x128xf32>
    %180 = vector.broadcast %159 : vector<1x128xf32> to vector<8x128xf32>
    %181 = arith.addf %179, %180 : vector<8x128xf32>
    %cst_64 = arith.constant 0.000000e+00 : f32
    %182 = vector.broadcast %cst_64 : f32 to vector<8x128xf32>
    %183 = arith.maximumf %181, %182 : vector<8x128xf32>
    %184 = arith.truncf %183 : vector<8x128xf32> to vector<8x128xbf16>
    %c0_65 = arith.constant 0 : index
    %c0_66 = arith.constant 0 : index
    %185 = vector.load %arg7[%c0_65, %c0_66] : memref<128x64xbf16, #tpu.memory_space<vmem>>, vector<128x64xbf16>
    %cst_67 = arith.constant dense<0.000000e+00> : vector<8x64xf32>
    %186 = tpu.matmul %184, %185, %cst_67 {dimension_numbers = #tpu.dot_dimension_numbers<[1], [0], [0], [1], [0, 0, 1, 1], [], []>} : vector<8x128xbf16>, vector<128x64xbf16>, vector<8x64xf32> -> vector<8x64xf32>
    %c12 = arith.constant 12 : index
    %c0_68 = arith.constant 0 : index
    %187 = vector.load %arg3[%c12, %c0_68] : memref<24x256xf32, #tpu.memory_space<vmem>>, vector<1x64xf32>
    %188 = vector.broadcast %187 : vector<1x64xf32> to vector<8x64xf32>
    %189 = arith.addf %186, %188 : vector<8x64xf32>
    %c13 = arith.constant 13 : index
    %c0_69 = arith.constant 0 : index
    %190 = vector.load %arg3[%c13, %c0_69] : memref<24x256xf32, #tpu.memory_space<vmem>>, vector<1x64xf32>
    %c14 = arith.constant 14 : index
    %c0_70 = arith.constant 0 : index
    %191 = vector.load %arg3[%c14, %c0_70] : memref<24x256xf32, #tpu.memory_space<vmem>>, vector<1x64xf32>
    %cst_71 = arith.constant dense<0.000000e+00> : vector<64xf32>
    %192 = vector.multi_reduction <add>, %189, %cst_71 [0] : vector<8x64xf32> to vector<64xf32>
    %193 = vector.shape_cast %192 : vector<64xf32> to vector<1x64xf32>
    %cst_72 = arith.constant 8.000000e+00 : f32
    %194 = vector.broadcast %cst_72 : f32 to vector<1x64xf32>
    %195 = arith.divf %193, %194 : vector<1x64xf32>
    %196 = vector.broadcast %195 : vector<1x64xf32> to vector<8x64xf32>
    %197 = arith.subf %189, %196 : vector<8x64xf32>
    %198 = arith.mulf %197, %197 : vector<8x64xf32>
    %cst_73 = arith.constant dense<0.000000e+00> : vector<64xf32>
    %199 = vector.multi_reduction <add>, %198, %cst_73 [0] : vector<8x64xf32> to vector<64xf32>
    %200 = vector.shape_cast %199 : vector<64xf32> to vector<1x64xf32>
    %cst_74 = arith.constant 8.000000e+00 : f32
    %201 = vector.broadcast %cst_74 : f32 to vector<1x64xf32>
    %202 = arith.divf %200, %201 : vector<1x64xf32>
    %203 = vector.broadcast %195 : vector<1x64xf32> to vector<8x64xf32>
    %204 = arith.subf %189, %203 : vector<8x64xf32>
    %cst_75 = arith.constant 9.99999974E-6 : f32
    %205 = vector.broadcast %cst_75 : f32 to vector<1x64xf32>
    %206 = arith.addf %202, %205 : vector<1x64xf32>
    %207 = math.rsqrt %206 : vector<1x64xf32>
    %208 = vector.broadcast %207 : vector<1x64xf32> to vector<8x64xf32>
    %209 = arith.mulf %204, %208 : vector<8x64xf32>
    %210 = vector.broadcast %190 : vector<1x64xf32> to vector<8x64xf32>
    %211 = arith.mulf %209, %210 : vector<8x64xf32>
    %212 = vector.broadcast %191 : vector<1x64xf32> to vector<8x64xf32>
    %213 = arith.addf %211, %212 : vector<8x64xf32>
    %c15 = arith.constant 15 : index
    %c0_76 = arith.constant 0 : index
    %214 = vector.load %arg3[%c15, %c0_76] : memref<24x256xf32, #tpu.memory_space<vmem>>, vector<1x64xf32>
    %c16 = arith.constant 16 : index
    %c0_77 = arith.constant 0 : index
    %215 = vector.load %arg3[%c16, %c0_77] : memref<24x256xf32, #tpu.memory_space<vmem>>, vector<1x64xf32>
    %cst_78 = arith.constant dense<0.000000e+00> : vector<8xf32>
    %216 = vector.multi_reduction <add>, %213, %cst_78 [1] : vector<8x64xf32> to vector<8xf32>
    %217 = vector.shape_cast %216 : vector<8xf32> to vector<8x1xf32>
    %cst_79 = arith.constant 6.400000e+01 : f32
    %218 = vector.broadcast %cst_79 : f32 to vector<8x1xf32>
    %219 = arith.divf %217, %218 : vector<8x1xf32>
    %220 = vector.broadcast %219 : vector<8x1xf32> to vector<8x64xf32>
    %221 = arith.subf %213, %220 : vector<8x64xf32>
    %222 = arith.mulf %221, %221 : vector<8x64xf32>
    %cst_80 = arith.constant dense<0.000000e+00> : vector<8xf32>
    %223 = vector.multi_reduction <add>, %222, %cst_80 [1] : vector<8x64xf32> to vector<8xf32>
    %224 = vector.shape_cast %223 : vector<8xf32> to vector<8x1xf32>
    %cst_81 = arith.constant 6.400000e+01 : f32
    %225 = vector.broadcast %cst_81 : f32 to vector<8x1xf32>
    %226 = arith.divf %224, %225 : vector<8x1xf32>
    %227 = vector.broadcast %219 : vector<8x1xf32> to vector<8x64xf32>
    %228 = arith.subf %213, %227 : vector<8x64xf32>
    %cst_82 = arith.constant 9.99999974E-6 : f32
    %229 = vector.broadcast %cst_82 : f32 to vector<8x1xf32>
    %230 = arith.addf %226, %229 : vector<8x1xf32>
    %231 = math.rsqrt %230 : vector<8x1xf32>
    %232 = vector.broadcast %231 : vector<8x1xf32> to vector<8x64xf32>
    %233 = arith.mulf %228, %232 : vector<8x64xf32>
    %234 = vector.broadcast %214 : vector<1x64xf32> to vector<8x64xf32>
    %235 = arith.mulf %233, %234 : vector<8x64xf32>
    %236 = vector.broadcast %215 : vector<1x64xf32> to vector<8x64xf32>
    %237 = arith.addf %235, %236 : vector<8x64xf32>
    %cst_83 = arith.constant 0.000000e+00 : f32
    %238 = vector.broadcast %cst_83 : f32 to vector<8x64xf32>
    %239 = arith.maximumf %237, %238 : vector<8x64xf32>
    %c17 = arith.constant 17 : index
    %c0_84 = arith.constant 0 : index
    %240 = vector.load %arg3[%c17, %c0_84] : memref<24x256xf32, #tpu.memory_space<vmem>>, vector<1x64xf32>
    %c18 = arith.constant 18 : index
    %c0_85 = arith.constant 0 : index
    %241 = vector.load %arg3[%c18, %c0_85] : memref<24x256xf32, #tpu.memory_space<vmem>>, vector<1x1xf32>
    %242 = vector.broadcast %240 : vector<1x64xf32> to vector<8x64xf32>
    %243 = arith.mulf %239, %242 : vector<8x64xf32>
    %cst_86 = arith.constant dense<0.000000e+00> : vector<8xf32>
    %244 = vector.multi_reduction <add>, %243, %cst_86 [1] : vector<8x64xf32> to vector<8xf32>
    %245 = vector.shape_cast %244 : vector<8xf32> to vector<8x1xf32>
    %246 = vector.broadcast %241 : vector<1x1xf32> to vector<8x1xf32>
    %247 = arith.addf %245, %246 : vector<8x1xf32>
    %248 = vector.shape_cast %247 : vector<8x1xf32> to vector<8x1xf32>
    %249 = vector.broadcast %248 : vector<8x1xf32> to vector<8x128xf32>
    %c0_87 = arith.constant 0 : index
    %c0_88 = arith.constant 0 : index
    %250 = vector.load %arg8[%c0_87, %c0_88] : memref<8x128xf32, #tpu.memory_space<vmem>>, vector<8x128xf32>
    tpu.vector_store %arg8[%c0_87, %c0_88], %249 {strides = array<i32>} : memref<8x128xf32, #tpu.memory_space<vmem>>, vector<8x128xf32>,
    return
  }
}

</mosaic_0001>

<bundles_post_ra>
// kernel: mlp_forward.1
= control target key start
LH: loop header
LB: loop body
LE: loop exit
PB: predicated region body
PF: predicated region fallthrough
CT: control target
= control target key end

     0   :  { %13 = vsyncpa [#allocation3], 0  ;;  %s1463_s0 = inlined_call_operand.vmem [shape: f32[8,32], index: 0, kind: input, shape index: {}]   ;;  %s1464_s1 = inlined_call_operand.vmem [shape: s32[8,4], index: 1, kind: input, shape index: {}]   ;;  %s1465_s2 = inlined_call_operand.hbm [shape: f32[256,128], index: 2, kind: input, shape index: {}]   ;;  %s1466_s3 = inlined_call_operand.vmem [shape: f32[24,256], index: 3, kind: input, shape index: {}]   ;;  %s1467_s4 = inlined_call_operand.vmem [shape: bf16[32,256], index: 4, kind: input, shape index: {}]   ;;  %s1468_s5 = inlined_call_operand.hbm [shape: bf16[128,256], index: 5, kind: input, shape index: {}]   ;;  %s1469_s6 = inlined_call_operand.hbm [shape: bf16[256,128], index: 6, kind: input, shape index: {}]   ;;  %s1470_s7 = inlined_call_operand.vmem [shape: bf16[128,64], index: 7, kind: input, shape index: {}]   ;;  %s1471_s8 = inlined_call_operand.vmem [shape: f32[8,128], index: 8, kind: output, shape index: {}]  }
   0x1   :  { %14 = vsyncpa [#allocation5], 0  ;;  %s1258_s27 = smov [#allocation4]   ;;  %s1259_s29 = smov [#allocation2]  }
   0x2   :  { %s40_s28 = sshll.u32 %s1258_s27, 4  ;;  %s24_s30 = sshll.u32 %s1259_s29, 4  ;;  %s41_s28 = int_to_ptr.vmem [resolvable:$true] %s40_s28  ;;  %s25_s30 = int_to_ptr.vmem [resolvable:$true] %s24_s30 }
   0x3   :  { %s1202_s9 = scalar_lea.vmem %s41_s28, 2048  ;;  %p1207_p1 = scmp.lt.s32.totalorder %s41_s28, %s41_s28 }
   0x4   :  { %p1203_p0 = scmp.ne.s32.totalorder %s41_s28, %s1202_s9  ;;  %p1208_p2 = scmp.lt.s32.totalorder %s1202_s9, %s1202_s9 }
   0x6   :  { %p1209_p3 = por %p1208_p2, %p1207_p1 }
   0x8   :  { %p1210_p4 = pnand %p1209_p3, %p1203_p0 }
   0xa   :  { %1213 = shalt.err (!%p1210_p4)
}
   0xb   :  { %s1260_s10 = smov 128   ;;  %s1261_s11 = smov 8  }
   0xc   :  { %46 = dma.hbm_to_vmem [thread:$0]  %s1468_s5, 2048, %s41_s28, [#allocation5], %s1260_s10, %s1260_s10, %s1261_s11  }
   0xd   :  { %s1222_s14 = scalar_lea.vmem %s25_s30, 4096  ;;  %p1227_p6 = scmp.lt.s32.totalorder %s25_s30, %s25_s30 }
   0xe   :  { %p1223_p5 = scmp.ne.s32.totalorder %s25_s30, %s1222_s14  ;;  %p1228_p7 = scmp.lt.s32.totalorder %s1222_s14, %s1222_s14 }
  0x10   :  { %p1229_p8 = por %p1228_p7, %p1227_p6 }
  0x12   :  { %p1230_p9 = pnand %p1229_p8, %p1223_p5 }
  0x14   :  { %1233 = shalt.err (!%p1230_p9)
}
  0x15   :  { %30 = dma.hbm_to_vmem [thread:$0]  %s1465_s2, 4096, %s25_s30, [#allocation3], %s1260_s10, %s1260_s10, %s1261_s11  }
  0x16   :  { %s1262_s17 = smov [#allocation6]  }
  0x17   :  { %s52_s18 = sshll.u32 %s1262_s17, 4  ;;  %s53_s18 = int_to_ptr.vmem [resolvable:$true] %s52_s18 }
  0x18   :  { %s1242_s19 = scalar_lea.vmem %s53_s18, 2048  ;;  %p1247_p11 = scmp.lt.s32.totalorder %s53_s18, %s53_s18 }
  0x19   :  { %p1243_p10 = scmp.ne.s32.totalorder %s53_s18, %s1242_s19  ;;  %p1248_p12 = scmp.lt.s32.totalorder %s1242_s19, %s1242_s19 }
  0x1b   :  { %p1249_p13 = por %p1248_p12, %p1247_p11 }
  0x1d   :  { %p1250_p0 = pnand %p1249_p13, %p1243_p10 }
  0x1f   :  { %1253 = shalt.err (!%p1250_p0)
}
  0x20   :  { %s1263_s5 = smov 64   ;;  %s1264_s20 = smov 4  }
  0x21   :  { %58 = dma.hbm_to_vmem [thread:$0]  %s1469_s6, 2048, %s53_s18, [#allocation5], %s1263_s5, %s1263_s5, %s1264_s20  }
  0x22   :  { %1254 = dma.done.wait [#allocation3], 4096  }
  0x23   :  { %1255 = vsyncadd [#allocation3], 4294963200 }
  0x24   :  { %1256 = dma.done.wait [#allocation5], 4096  }
  0x25   :  { %1257 = vsyncadd [#allocation5], 4294963200  ;;  %v1265_v0 = vmov 0   ;;  %v1266_v1 = vmov 2   ;;  %v74_v2 = vld [vmem:[%s1464_s1] sm:$0xff]  ;;  %v139_v3 = vld [vmem:[#allocation2 + $0xf8] sm:$0xff]  ;;  %v71_v40 = vlaneseq }
  0x26   :  { %1118 = vset.pattern.permute.xlu0 %v1265_v0  ;;  %1120 = vset.pattern.permute.xlu1 %v1266_v1  ;;  %v123_v4 = vld [vmem:[#allocation2 + $0x78] sm:$0xff]  ;;  %v88_v5 = vadd.s32 35, %v74_v2  ;;  %v138_v6 = vld [vmem:[#allocation2 + $0xf0] sm:$0xff]  ;;  %v80_v8 = vadd.s32 5, %v74_v2  ;;  %v137_v9 = vld [vmem:[#allocation2 + $0xe8] sm:$0xff]  ;;  %v96_v11 = vadd.s32 65, %v74_v2 }
  0x27   :  { %377 = vmatprep.mubr.bf16.mxu1 %v1265_v0  ;;  %76 = vperm.xlu0 %1118, %v74_v2   ;;  %v122_v7 = vld [vmem:[#allocation2 + $0x70] sm:$0xff]  ;;  %v121_v10 = vld [vmem:[#allocation2 + $0x68] sm:$0xff]  ;;  %v136_v12 = vld [vmem:[#allocation2 + $0xe0] sm:$0xff]  ;;  %v1267_v13 = vmov 1   ;;  %v1268_v16 = vmov 3   ;;  %v72_v42 = vand.u32 127, %v71_v40 }
  0x28   :  { %1018 = vmatprep.subr.mxu0 %v139_v3  ;;  %90 = vperm.xlu1 %1120, %v88_v5   ;;  %v120_v14 = vld [vmem:[#allocation2 + $0x60] sm:$0xff]  ;;  %v135_v15 = vld [vmem:[#allocation2 + $0xd8] sm:$0xff]  ;;  %v134_v18 = vld [vmem:[#allocation2 + $0xd0] sm:$0xff]  ;;  %v1269_v47 = vmov 1.0   ;;  %vm211_vm14 = vcmask 261120   ;;  %vm1271_vm15 = vmmov 0  }
  0x29   :  { %1019 = vmatpush3.msra.mxu0 %v123_v4  ;;  %v119_v17 = vld [vmem:[#allocation2 + $0x58] sm:$0xff]  ;;  %v118_v19 = vld [vmem:[#allocation2 + $0x50] sm:$0xff]  ;;  %v133_v20 = vld [vmem:[#allocation2 + $0xc8] sm:$0xff]  ;;  %v73_v44 = vadd.s32 128, %v72_v42 }
  0x2a   :  { %1020 = vmatprep.subr.mxu0 %v138_v6  ;;  %v117_v21 = vld [vmem:[#allocation2 + $0x48] sm:$0xff]  ;;  %v132_v22 = vld [vmem:[#allocation2 + $0xc0] sm:$0xff]  ;;  %v131_v24 = vld [vmem:[#allocation2 + $0xb8] sm:$0xff] }
  0x2b   :  { %1021 = vmatpush3.msra.mxu0 %v122_v7  ;;  %1119 = vset.pattern.permute.xlu0 %v1267_v13  ;;  %v116_v23 = vld [vmem:[#allocation2 + $0x40] sm:$0xff]  ;;  %v115_v25 = vld [vmem:[#allocation2 + $0x38] sm:$0xff]  ;;  %v130_v26 = vld [vmem:[#allocation2 + $0xb0] sm:$0xff] }
  0x2c   :  { %1022 = vmatprep.subr.mxu0 %v137_v9  ;;  %82 = vperm.xlu0 %1119, %v80_v8   ;;  %v114_v27 = vld [vmem:[#allocation2 + $0x30] sm:$0xff]  ;;  %v129_v28 = vld [vmem:[#allocation2 + $0xa8] sm:$0xff]  ;;  %v128_v30 = vld [vmem:[#allocation2 + $0xa0] sm:$0xff] }
  0x2d   :  { %1023 = vmatpush3.msra.mxu0 %v121_v10  ;;  %1121 = vset.pattern.permute.xlu1 %v1268_v16  ;;  %v113_v29 = vld [vmem:[#allocation2 + $0x28] sm:$0xff]  ;;  %v112_v31 = vld [vmem:[#allocation2 + $0x20] sm:$0xff]  ;;  %v127_v32 = vld [vmem:[#allocation2 + $0x98] sm:$0xff] }
  0x2e   :  { %1024 = vmatprep.subr.mxu0 %v136_v12  ;;  %98 = vperm.xlu1 %1121, %v96_v11   ;;  %v111_v33 = vld [vmem:[#allocation2 + $0x18] sm:$0xff]  ;;  %v126_v34 = vld [vmem:[#allocation2 + $0x90] sm:$0xff]  ;;  %v125_v36 = vld [vmem:[#allocation2 + $0x88] sm:$0xff] }
  0x2f   :  { %1025 = vmatpush3.msra.mxu0 %v120_v14  ;;  %v110_v35 = vld [vmem:[#allocation2 + $0x10] sm:$0xff]  ;;  %v109_v37 = vld [vmem:[#allocation2 + $0x8] sm:$0xff]  ;;  %v124_v38 = vld [vmem:[#allocation2 + $0x80] sm:$0xff] }
  0x30   :  { %1026 = vmatprep.subr.mxu0 %v135_v15  ;;  %1123 = vset.pattern.permute.xlu0 %v1265_v0  ;;  %v108_v39 = vld [vmem:[#allocation2] sm:$0xff]  ;;  %v1124_v53 = vld [vmem:[#allocation4 + $0x74] ss:$8 sps:$4 sm:$0xff]   ;;  %v1126_v54 = vld [vmem:[#allocation4 + $0x70] ss:$8 sps:$4 sm:$0xff]  }
  0x31   :  { %1027 = vmatpush3.msra.mxu0 %v119_v17  ;;  %v210_v48 = vld [vmem:[%s1463_s0] sm:$0xff]  ;;  %345 = vmatprep.subr.bf16.mxu1 %v1124_v53  ;;  %v1130_v2 = vld [vmem:[#allocation4 + $0x54] ss:$8 sps:$4 sm:$0xff]   ;;  %v1132_v3 = vld [vmem:[#allocation4 + $0x50] ss:$8 sps:$4 sm:$0xff]  }
  0x32   :  { %1028 = vmatprep.subr.mxu0 %v134_v18  ;;  %1122 = vset.pattern.permute.xlu1 %v1265_v0  ;;  %v212_v49 = vsel %vm211_vm14, %v210_v48, 0.0  ;;  %v1129_v1 = vld [vmem:[#allocation4 + $0x60] ss:$8 sps:$4 sm:$0xff]   ;;  %v1133_v4 = vld [vmem:[#allocation4 + $0x44] ss:$8 sps:$4 sm:$0xff]  }
  0x33   :  { %1029 = vmatpush3.msra.mxu0 %v118_v19  ;;  %346 = vmatpush1.bf16.msra.mxu1 %v1126_v54  ;;  %v1135_v5 = vld [vmem:[#allocation4 + $0x40] ss:$8 sps:$4 sm:$0xff]   ;;  %v1136_v6 = vld [vmem:[#allocation4 + $0x34] ss:$8 sps:$4 sm:$0xff]   ;;  %v1138_v7 = vld [vmem:[#allocation4 + $0x30] ss:$8 sps:$4 sm:$0xff]  }
  0x34   :  { %1030 = vmatprep.subr.mxu0 %v133_v20  ;;  %v1139_v8 = vld [vmem:[#allocation4 + $0x24] ss:$8 sps:$4 sm:$0xff]   ;;  %v1141_v9 = vld [vmem:[#allocation4 + $0x20] ss:$8 sps:$4 sm:$0xff]   ;;  %v1142_v10 = vld [vmem:[#allocation4 + $0x14] ss:$8 sps:$4 sm:$0xff]  }
  0x35   :  { %1031 = vmatpush3.msra.mxu0 %v117_v21  ;;  %v1146_v11 = vld [vmem:[%s1467_s4 + $0x14] ss:$8 sps:$4 sm:$0xff]   ;;  %v1144_v12 = vld [vmem:[%s1467_s4 + $0x10] ss:$8 sps:$4 sm:$0xff]   ;;  %v1148_v14 = vld [vmem:[#allocation4 + $0x4] ss:$8 sps:$4 sm:$0xff]  }
  0x36   :  { %1032 = vmatprep.subr.mxu0 %v132_v22  ;;  %v1147_v13 = vld [vmem:[#allocation4 + $0x10] ss:$8 sps:$4 sm:$0xff]   ;;  %v1152_v15 = vld [vmem:[%s1467_s4 + $0x4] ss:$8 sps:$4 sm:$0xff]   ;;  %v1150_v16 = vld [vmem:[%s1467_s4] ss:$8 sps:$4 sm:$0xff]  }
  0x37   :  { %1033 = vmatpush3.msra.mxu0 %v116_v23  ;;  %v1153_v17 = vld [vmem:[#allocation4] ss:$8 sps:$4 sm:$0xff]  }
  0x38   :  { %1034 = vmatprep.subr.mxu0 %v131_v24  ;;  %v239_v24 = vld [vmem:[%s1466_s3 + $0x8] ss:$0 sm:$0xff] }
  0x39   :  { %1035 = vmatpush3.msra.mxu0 %v115_v25  ;;  %v234_v25 = vld [vmem:[%s1466_s3] ss:$0 sm:$0xff] }
  0x3a   :  { %1036 = vmatprep.subr.mxu0 %v130_v26 }
  0x3b   :  { %1037 = vmatpush3.msra.mxu0 %v114_v27 }
  0x3c   :  { %1038 = vmatprep.subr.mxu0 %v129_v28  ;;  %v241_v28 = vld [vmem:[%s1466_s3 + $0x9] ss:$0 sm:$0xff] }
  0x3d   :  { %1039 = vmatpush3.msra.mxu0 %v113_v29  ;;  %v236_v29 = vld [vmem:[%s1466_s3 + $0x1] ss:$0 sm:$0xff] }
  0x3e   :  { %1040 = vmatprep.subr.mxu0 %v128_v30 }
  0x3f   :  { %1041 = vmatpush3.msra.mxu0 %v112_v31 }
  0x40   :  { %1042 = vmatprep.subr.mxu0 %v127_v32 }
  0x41   :  { %1043 = vmatpush3.msra.mxu0 %v111_v33 }
  0x42   :  { %1044 = vmatprep.subr.mxu0 %v126_v34 }
  0x43   :  { %1045 = vmatpush3.msra.mxu0 %v110_v35 }
  0x44   :  { %1046 = vmatprep.subr.mxu0 %v125_v36  ;;  %v454_v36 = vshrl.u32 %v71_v40, 7 }
  0x45   :  { %1047 = vmatpush3.msra.mxu0 %v109_v37 }
  0x46   :  { %1048 = vmatprep.subr.mxu0 %v124_v38  ;;  %v1366_v37 = vsub.s32 0, %v454_v36  ;;  %v989_v38 = vld [vmem:[%s1466_s3 + $0x2] ss:$8 sm:$0x3] }
  0x47   :  { %1049 = vmatpush3.msra.mxu0 %v108_v39  ;;  %v1371_v39 = vsub.s32 1, %v454_v36 }
  0x48   :  { %421 = vmatprep.subr.bf16.mxu0 %v1146_v11 }
  0x52   :  { %213 = vadd.xlane.f32.xlu1 %v212_v49 }
  0xa2   :  { %v77_v41 = vpop.permute.xlu0 %76 }
  0xa3   :  { %v91_v43 = vpop.permute.xlu1 %90  ;;  %vm78_vm0 = vcmp.eq.s32.totalorder %v72_v42, %v77_v41  ;;  %vm79_vm7 = vcmp.eq.s32.totalorder %v73_v44, %v77_v41  ;;  %v456_v41 = vrot.slane %v989_v38, %v1366_v37 }
  0xa4   :  { %vm92_vm2 = vcmp.eq.s32.totalorder %v72_v42, %v91_v43  ;;  %vm93_vm10 = vcmp.eq.s32.totalorder %v73_v44, %v91_v43 }
  0xa7   :  { %v83_v45 = vpop.permute.xlu0 %82 }
  0xa8   :  { %vm84_vm1 = vcmp.eq.s32.totalorder %v72_v42, %v83_v45  ;;  %vm85_vm3 = vcmp.eq.s32.totalorder %v73_v44, %v83_v45  ;;  %v460_v45 = vrot.slane %v989_v38, %v1371_v39 }
  0xa9   :  { %vm86_vm4 = vmor %vm78_vm0, %vm84_vm1  ;;  %v99_v46 = vpop.permute.xlu1 %98  ;;  %vm902_vm0 = vcmask 523264  }
  0xaa   :  { %vm94_vm5 = vmor %vm86_vm4, %vm92_vm2  ;;  %vm100_vm6 = vcmp.eq.s32.totalorder %v72_v42, %v99_v46  ;;  %vm101_vm9 = vcmp.eq.s32.totalorder %v73_v44, %v99_v46 }
  0xab   :  { %vm102_vm8 = vmor %vm94_vm5, %vm100_vm6 }
  0xac   :  { %vm87_vm11 = vmor %vm79_vm7, %vm85_vm3 }
  0xad   :  { %vm95_vm12 = vmor %vm87_vm11, %vm93_vm10 }
  0xae   :  { %vm103_vm13 = vmor %vm95_vm12, %vm101_vm9 }
  0xaf   :  { %966 = vmatprep.mubr.msk.f32.mxu0 %vm103_vm13, %v1269_v47 }
  0xb0   :  { %967 = vmatmul.mubr.msk.f32.vlgmr.msra.gmra.mxu0 %vm102_vm8, %v1269_v47 }
  0xb1   :  { %441 = vmatprep.mubr.bf16.mxu0 %v1265_v0  ;;  %v1127_v0 = vld [vmem:[#allocation4 + $0x64] ss:$8 sps:$4 sm:$0xff]   ;;  %422 = vmatpush1.bf16.msra.mxu0 %v1144_v12 }
  0xb2   :  { %347 = vmatprep.subr.bf16.mxu1 %v1127_v0  ;;  %423 = vmatprep.subr.bf16.mxu0 %v1152_v15 }
  0xb3   :  { %348 = vmatpush1.bf16.msra.mxu1 %v1129_v1 }
  0xb4   :  { %349 = vmatprep.subr.bf16.mxu1 %v1130_v2 }
  0xb5   :  { %424 = vmatpush1.bf16.msra.mxu0 %v1150_v16 }
  0xb7   :  { %350 = vmatpush1.bf16.msra.mxu1 %v1132_v3 }
  0xb8   :  { %351 = vmatprep.subr.bf16.mxu1 %v1133_v4 }
  0xbb   :  { %352 = vmatpush1.bf16.msra.mxu1 %v1135_v5 }
  0xbc   :  { %353 = vmatprep.subr.bf16.mxu1 %v1136_v6 }
  0xbf   :  { %354 = vmatpush1.bf16.msra.mxu1 %v1138_v7 }
  0xc0   :  { %355 = vmatprep.subr.bf16.mxu1 %v1139_v8 }
  0xc3   :  { %356 = vmatpush1.bf16.msra.mxu1 %v1141_v9 }
  0xc4   :  { %357 = vmatprep.subr.bf16.mxu1 %v1142_v10 }
  0xc7   :  { %358 = vmatpush1.bf16.msra.mxu1 %v1147_v13 }
  0xc8   :  { %359 = vmatprep.subr.bf16.mxu1 %v1148_v14 }
  0xcb   :  { %360 = vmatpush1.bf16.msra.mxu1 %v1153_v17 }
  0xdb   :  { %v214_v55 = vpop.xlane.xlu1 %213 }
 0x170   :  { %v1050_v50 = vpop.f32.mrf.mxu0 }
 0x172   :  { %v1051_v51 = vpop.f32.mrf.mxu0 }
 0x173   :  { %v1052_v52 = vadd.f32 %v1051_v51, %v1050_v50 }
 0x175   :  { %215 = vadd.xlane.f32.xlu0 %v1052_v52 }
 0x1fe   :  { %v216_v56 = vpop.xlane.xlu0 %215 }
 0x1ff   :  { %v217_v57 = vadd.f32 %v216_v56, %v214_v55 }
 0x201   :  { %v219_v58 = vmul.f32 0.00625, %v217_v57 }
 0x203   :  { %v220_v59 = vsub.f32 %v210_v48, %v219_v58  ;;  %v221_v60 = vsub.f32 %v1052_v52, %v219_v58 }
 0x205   :  { %v226_v61 = vmul.f32 %v221_v60, %v221_v60  ;;  %v222_v62 = vmul.f32 %v220_v59, %v220_v59 }
 0x207   :  { %227 = vadd.xlane.f32.xlu1 %v226_v61  ;;  %v223_v63 = vsel %vm211_vm14, %v222_v62, 0.0 }
 0x208   :  { %224 = vadd.xlane.f32.xlu0 %v223_v63 }
 0x290   :  { %v228_v18 = vpop.xlane.xlu1 %227 }
 0x291   :  { %v225_v19 = vpop.xlane.xlu0 %224 }
 0x292   :  { %v229_v20 = vadd.f32 %v228_v18, %v225_v19 }
 0x294   :  { %v230_v21 = vmul.f32 0.00625, %v229_v20 }
 0x296   :  { %v231_v22 = vadd.f32 1e-05, %v230_v21 }
 0x298   :  { %1178 = vrsqrt.f32 %v231_v22 }
 0x2a5   :  { %v1179_v23 = vpop.eup %1178 }
 0x2a6   :  { %v233_v26 = vmul.f32 %v1179_v23, %v220_v59  ;;  %v238_v27 = vmul.f32 %v1179_v23, %v221_v60 }
 0x2a8   :  { %v240_v30 = vmul.f32 %v239_v24, %v238_v27  ;;  %v235_v31 = vmul.f32 %v234_v25, %v233_v26  ;;  %v990_v24 = vld [vmem:[%s1466_s3 + $0x3] ss:$8 sm:$0x3]  ;;  %v991_v27 = vld [vmem:[%s1466_s3 + $0x4] ss:$8 sm:$0x3] }
 0x2a9   :  { %v512_v25 = vrot.slane %v990_v24, %v1366_v37 }
 0x2aa   :  { %v242_v32 = vadd.f32 %v241_v28, %v240_v30  ;;  %v237_v33 = vadd.f32 %v236_v29, %v235_v31  ;;  %v516_v29 = vrot.slane %v990_v24, %v1371_v39 }
 0x2ac   :  { %v248_v34 = vpack.c.bf16 %v242_v32, %v242_v32  ;;  %v243_v35 = vpack.c.bf16 %v237_v33, %v237_v33  ;;  %v525_v33 = vrot.slane %v991_v27, %v1366_v37 }
 0x2ae   :  { %378 = vmatmul.mubr.bf16.vlgmr.msra.gmra.mxu1 %v248_v34  ;;  %988 = vmatmul.mubr.msk.bf16.vlgmr.msra.gmra.mxu0 %vm211_vm14, %v243_v35  ;;  %v529_v34 = vrot.slane %v991_v27, %v1371_v39 }
 0x36e   :  { %v379_v42 = vpop.f32.mrf.mxu1  ;;  %v443_v43 = vpop.f32.mrf.mxu0 }
 0x36f   :  { %v444_v44 = vadd.f32 %v443_v43, %v379_v42  ;;  %v1154_v42 = vld [vmem:[#allocation6 + $0x78] sm:$0xff]  }
 0x370   :  { %v381_v46 = vpop.f32.mrf.mxu1  ;;  %v445_v47 = vpop.f32.mrf.mxu0  ;;  %v1155_v43 = vld [vmem:[#allocation6 + $0x38] sm:$0xff]   ;;  %1053 = vmatprep.subr.bf16.mxu1 %v1154_v42 }
 0x371   :  { %v463_v48 = vadd.f32 %v456_v41, %v444_v44  ;;  %v446_v49 = vadd.f32 %v445_v47, %v381_v46  ;;  %1054 = vmatpush3.bf16.msra.mxu1 %v1155_v43 }
 0x372   :  { %v383_v40 = vpop.f32.mrf.mxu1  ;;  %v447_v50 = vpop.f32.mrf.mxu0 }
 0x373   :  { %v469_v51 = vrot.slane %v463_v48, 4  ;;  %v464_v52 = vadd.f32 %v460_v45, %v446_v49  ;;  %v1156_v50 = vld [vmem:[#allocation6 + $0x70] sm:$0xff]  }
 0x374   :  { %v384_v53 = vpop.f32.mrf.mxu1  ;;  %v448_v54 = vpop.f32.mrf.mxu0  ;;  %1055 = vmatprep.subr.bf16.mxu1 %v1156_v50  ;;  %v1170_v50 = vld [vmem:[%s1470_s7 + $0x38] sm:$0xff]  }
 0x375   :  { %v470_v55 = vadd.f32 %v469_v51, %v463_v48  ;;  %v475_v56 = vrot.slane %v464_v52, 4  ;;  %v1157_v51 = vld [vmem:[#allocation6 + $0x30] sm:$0xff]   ;;  %v1159_v53 = vld [vmem:[#allocation6 + $0x28] sm:$0xff]   ;;  %v1160_v54 = vld [vmem:[#allocation6 + $0x60] sm:$0xff]  }
 0x376   :  { %1056 = vmatpush3.bf16.msra.mxu1 %v1157_v51  ;;  %v1270_v51 = vmov 0.0  }
 0x377   :  { %v471_v57 = vrot.slane %v470_v55, 2  ;;  %v476_v58 = vadd.f32 %v475_v56, %v464_v52  ;;  %v1162_v56 = vld [vmem:[#allocation6 + $0x58] sm:$0xff]   ;;  %1084 = vmatprep.subr.bf16.mxu0 %v1270_v51  ;;  %1100 = vmatprep.mubr.msk.bf16.mxu0 %vm1271_vm15, %v1270_v51 }
 0x378   :  { %1085 = vmatpush3.bf16.msra.mxu0 %v1170_v50 }
 0x379   :  { %v472_v59 = vadd.f32 %v471_v57, %v470_v55  ;;  %v477_v60 = vrot.slane %v476_v58, 2  ;;  %v1161_v55 = vld [vmem:[#allocation6 + $0x20] sm:$0xff]   ;;  %v1163_v57 = vld [vmem:[#allocation6 + $0x18] sm:$0xff]   ;;  %1086 = vmatprep.subr.bf16.mxu0 %v1270_v51 }
 0x37b   :  { %v473_v61 = vrot.slane %v472_v59, 1  ;;  %v478_v62 = vadd.f32 %v477_v60, %v476_v58  ;;  %v1164_v58 = vld [vmem:[#allocation6 + $0x50] sm:$0xff]   ;;  %v1166_v60 = vld [vmem:[#allocation6 + $0x48] sm:$0xff]  }
 0x37d   :  { %v474_v63 = vadd.f32 %v473_v61, %v472_v59  ;;  %v479_v0 = vrot.slane %v478_v62, 1  ;;  %v1165_v59 = vld [vmem:[#allocation6 + $0x10] sm:$0xff]   ;;  %v1167_v61 = vld [vmem:[#allocation6 + $0x8] sm:$0xff]  }
 0x37f   :  { %v482_v1 = vmul.f32 0.125, %v474_v63  ;;  %v480_v2 = vadd.f32 %v479_v0, %v478_v62  ;;  %v1168_v62 = vld [vmem:[#allocation6 + $0x40] sm:$0xff]  }
 0x380   :  { %v1169_v63 = vld [vmem:[#allocation6] sm:$0xff]  }
 0x381   :  { %v484_v3 = vsub.f32 %v463_v48, %v482_v1  ;;  %v483_v4 = vmul.f32 0.125, %v480_v2 }
 0x383   :  { %v486_v5 = vmul.f32 %v484_v3, %v484_v3  ;;  %v485_v6 = vsub.f32 %v464_v52, %v483_v4  ;;  %v1158_v52 = vld [vmem:[#allocation6 + $0x68] sm:$0xff]  }
 0x384   :  { %1057 = vmatprep.subr.bf16.mxu1 %v1158_v52  ;;  %v993_v4 = vld [vmem:[%s1466_s3 + $0x6] ss:$8 sm:$0x3] }
 0x385   :  { %v488_v7 = vrot.slane %v486_v5, 4  ;;  %v487_v8 = vmul.f32 %v485_v6, %v485_v6  ;;  %1058 = vmatpush3.bf16.msra.mxu1 %v1159_v53 }
 0x386   :  { %1059 = vmatprep.subr.bf16.mxu1 %v1160_v54 }
 0x387   :  { %v489_v9 = vadd.f32 %v488_v7, %v486_v5  ;;  %v494_v10 = vrot.slane %v487_v8, 4 }
 0x389   :  { %v490_v11 = vrot.slane %v489_v9, 2  ;;  %v495_v12 = vadd.f32 %v494_v10, %v487_v8  ;;  %1060 = vmatpush3.bf16.msra.mxu1 %v1161_v55  ;;  %v576_v10 = vrot.slane %v993_v4, %v1371_v39 }
 0x38a   :  { %1061 = vmatprep.subr.bf16.mxu1 %v1162_v56  ;;  %v1171_v56 = vld [vmem:[%s1470_s7 + $0x30] sm:$0xff]  }
 0x38b   :  { %v491_v13 = vadd.f32 %v490_v11, %v489_v9  ;;  %v496_v14 = vrot.slane %v495_v12, 2  ;;  %v572_v9 = vrot.slane %v993_v4, %v1366_v37  ;;  %1087 = vmatpush3.bf16.msra.mxu0 %v1171_v56  ;;  %v945_v56 = vld [vmem:[%s1466_s3 + $0x21] ss:$0 sm:$0xff] }
 0x38c   :  { %1088 = vmatprep.subr.bf16.mxu0 %v1270_v51 }
 0x38d   :  { %v492_v15 = vrot.slane %v491_v13, 1  ;;  %v497_v16 = vadd.f32 %v496_v14, %v495_v12  ;;  %1062 = vmatpush3.bf16.msra.mxu1 %v1163_v57  ;;  %v1172_v57 = vld [vmem:[%s1470_s7 + $0x28] sm:$0xff]  }
 0x38e   :  { %1063 = vmatprep.subr.bf16.mxu1 %v1164_v58  ;;  %v1173_v58 = vld [vmem:[%s1470_s7 + $0x20] sm:$0xff]  }
 0x38f   :  { %v493_v17 = vadd.f32 %v492_v15, %v491_v13  ;;  %v498_v18 = vrot.slane %v497_v16, 1  ;;  %1089 = vmatpush3.bf16.msra.mxu0 %v1172_v57 }
 0x390   :  { %1090 = vmatprep.subr.bf16.mxu0 %v1270_v51 }
 0x391   :  { %v500_v19 = vmul.f32 0.125, %v493_v17  ;;  %v499_v20 = vadd.f32 %v498_v18, %v497_v16  ;;  %1064 = vmatpush3.bf16.msra.mxu1 %v1165_v59  ;;  %v1174_v59 = vld [vmem:[%s1470_s7 + $0x18] sm:$0xff]  }
 0x392   :  { %1065 = vmatprep.subr.bf16.mxu1 %v1166_v60  ;;  %v1175_v60 = vld [vmem:[%s1470_s7 + $0x10] sm:$0xff]  }
 0x393   :  { %v502_v21 = vadd.f32 1e-05, %v500_v19  ;;  %v501_v22 = vmul.f32 0.125, %v499_v20  ;;  %1091 = vmatpush3.bf16.msra.mxu0 %v1173_v58 }
 0x394   :  { %1092 = vmatprep.subr.bf16.mxu0 %v1270_v51 }
 0x395   :  { %1180 = vrsqrt.f32 %v502_v21  ;;  %v503_v23 = vadd.f32 1e-05, %v501_v22  ;;  %1066 = vmatpush3.bf16.msra.mxu1 %v1167_v61  ;;  %v617_v21 = vld [vmem:[%s1466_s3 + $0x7] ss:$0 sm:$0xff]  ;;  %v1176_v61 = vld [vmem:[%s1470_s7 + $0x8] sm:$0xff]  }
 0x396   :  { %1067 = vmatprep.subr.bf16.mxu1 %v1168_v62  ;;  %v1177_v62 = vld [vmem:[%s1470_s7] sm:$0xff]  }
 0x397   :  { %1182 = vrsqrt.f32 %v503_v23  ;;  %1093 = vmatpush3.bf16.msra.mxu0 %v1174_v59 }
 0x398   :  { %1094 = vmatprep.subr.bf16.mxu0 %v1270_v51 }
 0x399   :  { %1068 = vmatpush3.bf16.msra.mxu1 %v1169_v63 }
 0x39b   :  { %1095 = vmatpush3.bf16.msra.mxu0 %v1175_v60  ;;  %v946_v60 = vld [vmem:[%s1466_s3 + $0x22] ss:$0 sm:$0xff] }
 0x39c   :  { %1096 = vmatprep.subr.bf16.mxu0 %v1270_v51 }
 0x39f   :  { %1097 = vmatpush3.bf16.msra.mxu0 %v1176_v61 }
 0x3a0   :  { %1098 = vmatprep.subr.bf16.mxu0 %v1270_v51  ;;  %v926_v51 = vld [vmem:[%s1466_s3 + $0x17] ss:$0 sm:$0xff] }
 0x3a2   :  { %v1181_v26 = vpop.eup %1180 }
 0x3a3   :  { %v506_v28 = vmul.f32 %v1181_v26, %v484_v3  ;;  %v992_v3 = vld [vmem:[%s1466_s3 + $0x5] ss:$8 sm:$0x3]  ;;  %1099 = vmatpush3.bf16.msra.mxu0 %v1177_v62 }
 0x3a4   :  { %v1183_v30 = vpop.eup %1182  ;;  %v559_v5 = vrot.slane %v992_v3, %v1366_v37 }
 0x3a5   :  { %v507_v31 = vmul.f32 %v1183_v30, %v485_v6  ;;  %v519_v32 = vmul.f32 %v512_v25, %v506_v28  ;;  %v563_v6 = vrot.slane %v992_v3, %v1371_v39  ;;  %v777_v3 = vld [vmem:[%s1466_s3 + $0x12] ss:$0 sm:$0xff] }
 0x3a7   :  { %v520_v35 = vmul.f32 %v516_v29, %v507_v31  ;;  %v532_v36 = vadd.f32 %v525_v33, %v519_v32 }
 0x3a9   :  { %v533_v38 = vadd.f32 %v529_v34, %v520_v35 }
 0x3ab   :  { %v538_v41 = vadd.f32 %v533_v38, %v532_v36 }
 0x3ad   :  { %539 = vadd.xlane.f32.xlu0 %v538_v41 }
 0x436   :  { %v540_v44 = vpop.xlane.xlu0 %539 }
 0x437   :  { %v542_v45 = vmul.f32 0.00390625, %v540_v44 }
 0x439   :  { %v543_v46 = vsub.f32 %v532_v36, %v542_v45  ;;  %v544_v47 = vsub.f32 %v533_v38, %v542_v45 }
 0x43b   :  { %v545_v48 = vmul.f32 %v543_v46, %v543_v46  ;;  %v546_v49 = vmul.f32 %v544_v47, %v544_v47 }
 0x43d   :  { %v547_v40 = vadd.f32 %v546_v49, %v545_v48  ;;  %v755_v48 = vld [vmem:[%s1466_s3 + $0x11] ss:$0 sm:$0xff] }
 0x43f   :  { %548 = vadd.xlane.f32.xlu1 %v547_v40 }
 0x4c8   :  { %v549_v0 = vpop.xlane.xlu1 %548 }
 0x4c9   :  { %v550_v1 = vmul.f32 0.00390625, %v549_v0 }
 0x4cb   :  { %v551_v2 = vadd.f32 1e-05, %v550_v1 }
 0x4cd   :  { %1184 = vrsqrt.f32 %v551_v2 }
 0x4da   :  { %v1185_v7 = vpop.eup %1184 }
 0x4db   :  { %v554_v8 = vmul.f32 %v1185_v7, %v544_v47  ;;  %v553_v11 = vmul.f32 %v1185_v7, %v543_v46  ;;  %v754_v46 = vld [vmem:[%s1466_s3 + $0x10] ss:$0 sm:$0xff] }
 0x4dd   :  { %v567_v12 = vmul.f32 %v563_v6, %v554_v8  ;;  %v566_v13 = vmul.f32 %v559_v5, %v553_v11  ;;  %v778_v5 = vld [vmem:[%s1466_s3 + $0x13] ss:$0 sm:$0xff] }
 0x4df   :  { %v580_v14 = vadd.f32 %v576_v10, %v567_v12  ;;  %v579_v15 = vadd.f32 %v572_v9, %v566_v13  ;;  %v811_v10 = vld [vmem:[%s1466_s3 + $0x14] ss:$0 sm:$0xff] }
 0x4e1   :  { %v582_v16 = vmax.f32 %v580_v14, 0.0  ;;  %v581_v17 = vmax.f32 %v579_v15, 0.0 }
 0x4e3   :  { %v584_v18 = vpack.c.bf16 %v582_v16, %v582_v16  ;;  %v583_v19 = vpack.c.bf16 %v581_v17, %v581_v17 }
 0x4e5   :  { %746 = vmatprep.mubr.bf16.mxu1 %v584_v18 }
 0x4e6   :  { %747 = vmatmul.mubr.bf16.vlgmr.msra.gmra.mxu1 %v583_v19 }
 0x5a6   :  { %v1069_v20 = vpop.f32.mrf.mxu1 }
 0x5a8   :  { %v1070_v22 = vpop.f32.mrf.mxu1 }
 0x5a9   :  { %v1071_v37 = vadd.f32 %v1070_v22, %v1069_v20 }
 0x5aa   :  { %v1072_v23 = vpop.f32.mrf.mxu1 }
 0x5ab   :  { %v749_v39 = vadd.f32 %v1071_v37, %v617_v21 }
 0x5ac   :  { %v1073_v24 = vpop.f32.mrf.mxu1 }
 0x5ad   :  { %v756_v25 = vrot.slane %v749_v39, 4 }
 0x5af   :  { %v757_v26 = vadd.f32 %v756_v25, %v749_v39 }
 0x5b1   :  { %v758_v27 = vrot.slane %v757_v26, 2 }
 0x5b3   :  { %v759_v28 = vadd.f32 %v758_v27, %v757_v26 }
 0x5b5   :  { %v760_v29 = vrot.slane %v759_v28, 1 }
 0x5b7   :  { %v761_v30 = vadd.f32 %v760_v29, %v759_v28 }
 0x5b9   :  { %v762_v31 = vmul.f32 0.125, %v761_v30 }
 0x5bb   :  { %v763_v32 = vsub.f32 %v749_v39, %v762_v31 }
 0x5bd   :  { %v764_v33 = vmul.f32 %v763_v32, %v763_v32 }
 0x5bf   :  { %v765_v34 = vrot.slane %v764_v33, 4 }
 0x5c1   :  { %v766_v35 = vadd.f32 %v765_v34, %v764_v33  ;;  %v900_v34 = vld [vmem:[%s1466_s3 + $0x15] ss:$0 sm:$0xff] }
 0x5c3   :  { %v767_v36 = vrot.slane %v766_v35, 2 }
 0x5c5   :  { %v768_v38 = vadd.f32 %v767_v36, %v766_v35  ;;  %v901_v36 = vld [vmem:[%s1466_s3 + $0x16] ss:$0 sm:$0xff] }
 0x5c7   :  { %v769_v41 = vrot.slane %v768_v38, 1 }
 0x5c9   :  { %v770_v42 = vadd.f32 %v769_v41, %v768_v38 }
 0x5cb   :  { %v771_v43 = vmul.f32 0.125, %v770_v42 }
 0x5cd   :  { %v772_v44 = vadd.f32 1e-05, %v771_v43 }
 0x5cf   :  { %1186 = vrsqrt.f32 %v772_v44 }
 0x5dc   :  { %v1187_v45 = vpop.eup %1186 }
 0x5dd   :  { %v774_v47 = vmul.f32 %v1187_v45, %v763_v32 }
 0x5df   :  { %v775_v49 = vmul.f32 %v774_v47, %v754_v46 }
 0x5e1   :  { %v776_v40 = vadd.f32 %v775_v49, %v755_v48 }
 0x5e3   :  { %779 = vadd.xlane.f32.xlu0 %v776_v40 }
 0x66c   :  { %v780_v52 = vpop.xlane.xlu0 %779 }
 0x66d   :  { %v782_v53 = vmul.f32 0.0078125, %v780_v52 }
 0x66f   :  { %v783_v54 = vsub.f32 %v776_v40, %v782_v53  ;;  %v927_v53 = vld [vmem:[%s1466_s3 + $0x20] ss:$0 sm:$0xff] }
 0x671   :  { %v784_v55 = vmul.f32 %v783_v54, %v783_v54 }
 0x673   :  { %785 = vadd.xlane.f32.xlu1 %v784_v55 }
 0x6fc   :  { %v786_v63 = vpop.xlane.xlu1 %785 }
 0x6fd   :  { %v787_v0 = vmul.f32 0.0078125, %v786_v63 }
 0x6ff   :  { %v788_v1 = vadd.f32 1e-05, %v787_v0 }
 0x701   :  { %1188 = vrsqrt.f32 %v788_v1 }
 0x70e   :  { %v1189_v2 = vpop.eup %1188 }
 0x70f   :  { %v790_v4 = vmul.f32 %v1189_v2, %v783_v54 }
 0x711   :  { %v791_v6 = vmul.f32 %v790_v4, %v777_v3 }
 0x713   :  { %v792_v7 = vadd.f32 %v791_v6, %v778_v5 }
 0x715   :  { %v793_v8 = vmax.f32 %v792_v7, 0.0 }
 0x717   :  { %v794_v9 = vpack.c.bf16 %v793_v8, %v793_v8 }
 0x719   :  { %1101 = vmatmul.mubr.bf16.vlgmr.msra.gmra.mxu0 %v794_v9 }
 0x7d9   :  { %v894_v11 = vpop.f32.mrf.mxu0 }
 0x7da   :  { %v895_v12 = vadd.f32 %v894_v11, %v811_v10 }
 0x7db   :  { %v1102_v13 = vpop.f32.mrf.mxu0 }
 0x7dc   :  { %v903_v14 = vsel %vm902_vm0, %v895_v12, 0.0 }
 0x7dd   :  { %v904_v15 = vrot.slane %v903_v14, 4  ;;  %v897_v16 = vpop.f32.mrf.mxu0 }
 0x7df   :  { %v905_v17 = vadd.f32 %v904_v15, %v903_v14  ;;  %v1103_v18 = vpop.f32.mrf.mxu0 }
 0x7e1   :  { %v906_v19 = vrot.slane %v905_v17, 2 }
 0x7e3   :  { %v907_v20 = vadd.f32 %v906_v19, %v905_v17 }
 0x7e5   :  { %v908_v21 = vrot.slane %v907_v20, 1 }
 0x7e7   :  { %v909_v22 = vadd.f32 %v908_v21, %v907_v20 }
 0x7e9   :  { %v910_v37 = vmul.f32 0.125, %v909_v22 }
 0x7eb   :  { %v911_v23 = vsub.f32 %v895_v12, %v910_v37 }
 0x7ed   :  { %v912_v39 = vmul.f32 %v911_v23, %v911_v23 }
 0x7ef   :  { %v913_v24 = vsel %vm902_vm0, %v912_v39, 0.0 }
 0x7f0   :  { %v914_v25 = vrot.slane %v913_v24, 4 }
 0x7f2   :  { %v915_v26 = vadd.f32 %v914_v25, %v913_v24 }
 0x7f4   :  { %v916_v27 = vrot.slane %v915_v26, 2 }
 0x7f6   :  { %v917_v28 = vadd.f32 %v916_v27, %v915_v26 }
 0x7f8   :  { %v918_v29 = vrot.slane %v917_v28, 1 }
 0x7fa   :  { %v919_v30 = vadd.f32 %v918_v29, %v917_v28 }
 0x7fc   :  { %v920_v31 = vmul.f32 0.125, %v919_v30 }
 0x7fe   :  { %v921_v32 = vadd.f32 1e-05, %v920_v31 }
 0x800   :  { %1190 = vrsqrt.f32 %v921_v32 }
 0x80d   :  { %v1191_v33 = vpop.eup %1190 }
 0x80e   :  { %v923_v35 = vmul.f32 %v1191_v33, %v911_v23 }
 0x810   :  { %v924_v38 = vmul.f32 %v923_v35, %v900_v34 }
 0x812   :  { %v925_v41 = vadd.f32 %v924_v38, %v901_v36 }
 0x814   :  { %v928_v42 = vsel %vm902_vm0, %v925_v41, 0.0 }
 0x815   :  { %929 = vadd.xlane.f32.xlu0 %v928_v42 }
 0x89e   :  { %v930_v43 = vpop.xlane.xlu0 %929 }
 0x89f   :  { %v932_v44 = vmul.f32 0.015625, %v930_v43 }
 0x8a1   :  { %v933_v45 = vsub.f32 %v925_v41, %v932_v44 }
 0x8a3   :  { %v934_v46 = vmul.f32 %v933_v45, %v933_v45 }
 0x8a5   :  { %v935_v47 = vsel %vm902_vm0, %v934_v46, 0.0 }
 0x8a6   :  { %936 = vadd.xlane.f32.xlu1 %v935_v47 }
 0x92f   :  { %v937_v48 = vpop.xlane.xlu1 %936 }
 0x930   :  { %v938_v49 = vmul.f32 0.015625, %v937_v48 }
 0x932   :  { %v939_v40 = vadd.f32 1e-05, %v938_v49 }
 0x934   :  { %1192 = vrsqrt.f32 %v939_v40 }
 0x941   :  { %v1193_v50 = vpop.eup %1192 }
 0x942   :  { %v941_v52 = vmul.f32 %v1193_v50, %v933_v45 }
 0x944   :  { %v942_v54 = vmul.f32 %v941_v52, %v926_v51 }
 0x946   :  { %v943_v55 = vadd.f32 %v942_v54, %v927_v53 }
 0x948   :  { %v944_v57 = vmax.f32 %v943_v55, 0.0 }
 0x94a   :  { %v947_v58 = vmul.f32 %v945_v56, %v944_v57 }
 0x94c   :  { %v948_v59 = vsel %vm902_vm0, %v947_v58, 0.0 }
 0x94d   :  { %949 = vadd.xlane.f32.xlu0 %v948_v59 }
 0x9d6   :  { %v950_v61 = vpop.xlane.xlu0 %949 }
 0x9d7   :  { %v951_v62 = vadd.f32 %v950_v61, %v946_v60 }
 0x9d9   :  { %954 = vperm.xlu1 %1122, %v951_v62  }
 0xa54   :  { %v955_v63 = vpop.permute.xlu1 %954 }
 0xa55   :  { %957 = vst [vmem:[%s1471_s8] sm:$0xff] %v955_v63 }
 0xa56   :  { %962 = vsyncpa [#allocation3], 1 }
 0xa57   :  { %963 = vsyncpa [#allocation5], 1 }

</bundles_post_ra>
